<compile_context>
chip_gen: v7x
topology: tpu7x:2x2x1
jax: 0.10.0
libtpu: 0.0.40
codegen_flags: <defaults>
</compile_context>

<pallas_src>
import jax
import jax.numpy as jnp
from jax import lax
from jax.experimental import pallas as pl
from jax.experimental.pallas import tpu as pltpu

_HIGH = lax.Precision.HIGHEST
_LANE = 128


def _round_up(x, m):
    return ((x + m - 1) // m) * m


# ----------------------------------------------------------------------------
# Single fused Pallas kernel: the whole Critic forward.
#
#   h1 = relu(x0 @ Ws0 + x1 @ Ws1 + b1)   (convs+flatten+cat+fc1, folded)
#   h2 = relu(h1 @ W2 + b2)               (fc2; W2/b2 zero-padded to 128 lanes)
#   v  = h2 @ Wo + bo                     (value head padded to 128 lanes)
# ----------------------------------------------------------------------------
def _critic_kernel(x0_ref, x1_ref, ws0_ref, ws1_ref, b1_ref,
                   w2_ref, b2_ref, wo_ref, bo_ref, o_ref):
    h1 = jnp.dot(x0_ref[...], ws0_ref[...], preferred_element_type=jnp.float32)
    h1 = h1 + jnp.dot(x1_ref[...], ws1_ref[...],
                      preferred_element_type=jnp.float32)
    h1 = jnp.maximum(h1 + b1_ref[...], 0.0)

    h2 = jnp.dot(h1, w2_ref[...], preferred_element_type=jnp.float32)
    h2 = jnp.maximum(h2 + b2_ref[...], 0.0)

    v = jnp.dot(h2, wo_ref[...], preferred_element_type=jnp.float32)
    o_ref[...] = (v + bo_ref[...]).astype(o_ref.dtype)


def _critic_forward_impl(fused, state0, state1):
    B = state0.shape[0]
    x0 = state0.reshape(B, -1).astype(jnp.float32)   # NCHW flatten (torch .view)
    x1 = state1.astype(jnp.float32)

    k0 = x0.shape[1]
    k1 = x1.shape[1]
    h1_n = fused["w_s0"].shape[1]      # 256
    h2_n = fused["w2"].shape[1]        # 128 (padded from 64)
    out_n = fused["wo"].shape[1]       # 128 (padded from 1)

    tile_m = min(256, _round_up(B, 8))
    m_pad = _round_up(B, tile_m)
    if m_pad != B:
        x0 = jnp.pad(x0, ((0, m_pad - B), (0, 0)))
        x1 = jnp.pad(x1, ((0, m_pad - B), (0, 0)))

    resident = lambda i: (0, 0)        # weights stay VMEM-resident across grid
    out = pl.pallas_call(
        _critic_kernel,
        out_shape=jax.ShapeDtypeStruct((m_pad, out_n), jnp.float32),
        grid_spec=pltpu.PrefetchScalarGridSpec(
            num_scalar_prefetch=0,
            grid=(m_pad // tile_m,),
            in_specs=[
                pl.BlockSpec((tile_m, k0), lambda i: (i, 0)),   # x0 tile
                pl.BlockSpec((tile_m, k1), lambda i: (i, 0)),   # x1 tile
                pl.BlockSpec((k0, h1_n), resident),             # Ws0
                pl.BlockSpec((k1, h1_n), resident),             # Ws1
                pl.BlockSpec((1, h1_n), resident),              # b1
                pl.BlockSpec((h1_n, h2_n), resident),           # W2 (padded)
                pl.BlockSpec((1, h2_n), resident),              # b2 (padded)
                pl.BlockSpec((h2_n, out_n), resident),          # Wo (padded)
                pl.BlockSpec((1, out_n), resident),             # bo (padded)
            ],
            out_specs=pl.BlockSpec((tile_m, out_n), lambda i: (i, 0)),
        ),
        compiler_params=pltpu.CompilerParams(
            dimension_semantics=("parallel",),
            vmem_limit_bytes=32 * 1024 * 1024,
        ),
    )(x0, x1, fused["w_s0"], fused["w_s1"], fused["b1"],
      fused["w2"], fused["b2"], fused["wo"], fused["bo"])

    return out[:B, :1]                 # strip batch padding + lane padding


critic_forward = jax.jit(_critic_forward_impl)


# ----------------------------------------------------------------------------
# One-time parameter folding (plain JAX, init time only — not in the hot path)
# ----------------------------------------------------------------------------
def _conv_stack(params, x):
    """conv1 -> conv2 -> conv3 (stride 1, VALID, NCHW), no activations."""
    dn = ("NCHW", "OIHW", "NCHW")
    y = lax.conv_general_dilated(x, params["conv1_w"], (1, 1), "VALID",
                                 dimension_numbers=dn, precision=_HIGH)
    y = y + params["conv1_b"][None, :, None, None]
    y = lax.conv_general_dilated(y, params["conv2_w"], (1, 1), "VALID",
                                 dimension_numbers=dn, precision=_HIGH)
    y = y + params["conv2_b"][None, :, None, None]
    y = lax.conv_general_dilated(y, params["conv3_w"], (1, 1), "VALID",
                                 dimension_numbers=dn, precision=_HIGH)
    y = y + params["conv3_b"][None, :, None, None]
    return y


def fold_critic_params(params, image_shape):
    """Fold the (purely linear) conv stack + flatten + concat + fc1 into
    (Cin*H*W, 256) / (extra, 256) weight matrices, and pre-transpose / lane-pad
    fc2 and the value head."""
    c_in, h, w = image_shape
    in_flat = c_in * h * w

    # Linear map of the conv stack, probed with an identity basis batch.
    eye = jnp.eye(in_flat, dtype=jnp.float32).reshape(in_flat, c_in, h, w)
    zero = jnp.zeros((1, c_in, h, w), jnp.float32)
    conv_bias = _conv_stack(params, zero).reshape(-1)                    # (out_flat,)
    conv_mat = _conv_stack(params, eye).reshape(in_flat, -1) - conv_bias[None, :]
    out_flat = conv_mat.shape[1]                                         # 3*Ho*Wo

    w1 = params["fc1_w"]                    # (256, 120), torch layout
    b1 = params["fc1_b"]                    # (256,)
    w1a = w1[:, :out_flat]                  # acts on flattened conv output
    w1b = w1[:, out_flat:]                  # acts on state[1]

    w_s0 = jnp.dot(conv_mat, w1a.T, precision=_HIGH)                     # (in_flat, 256)
    w_s1 = w1b.T                                                         # (extra, 256)
    b1_f = jnp.dot(conv_bias, w1a.T, precision=_HIGH) + b1               # (256,)

    # fc2 / value head: store (K, N), zero-pad N to 128 lanes.
    w2 = params["fc2_w"].T                  # (256, 64)
    b2 = params["fc2_b"]                    # (64,)
    wo = params["out_w"].T                  # (64, 1)
    bo = params["out_b"]                    # (1,)

    h2_pad = _round_up(w2.shape[1], _LANE)  # 128
    out_pad = _LANE                         # 128
    w2_p = jnp.zeros((w2.shape[0], h2_pad), jnp.float32).at[:, :w2.shape[1]].set(w2)
    b2_p = jnp.zeros((h2_pad,), jnp.float32).at[:w2.shape[1]].set(b2)
    wo_p = jnp.zeros((h2_pad, out_pad), jnp.float32).at[:wo.shape[0], :wo.shape[1]].set(wo)
    bo_p = jnp.zeros((out_pad,), jnp.float32).at[:bo.shape[0]].set(bo)

    return {
        "w_s0": w_s0,
        "w_s1": w_s1,
        "b1": b1_f.reshape(1, -1),
        "w2": w2_p,
        "b2": b2_p.reshape(1, -1),
        "wo": wo_p,
        "bo": bo_p.reshape(1, -1),
    }


# ----------------------------------------------------------------------------
# Parameter initialization (deterministic, shapes from Critic.__init__)
# ----------------------------------------------------------------------------
def _xavier_uniform_conv(key, shape):
    cout, cin, kh, kw = shape
    fan_in = cin * kh * kw
    fan_out = cout * kh * kw
    limit = (6.0 / (fan_in + fan_out)) ** 0.5
    return jax.random.uniform(key, shape, jnp.float32, -limit, limit)


def _uniform_bias(key, fan_in, n):
    limit = 1.0 / (fan_in ** 0.5)
    return jax.random.uniform(key, (n,), jnp.float32, -limit, limit)


def _linear_init(key, in_f, out_f):
    kw, kb = jax.random.split(key)
    limit = 1.0 / (in_f ** 0.5)
    w = jax.random.uniform(kw, (out_f, in_f), jnp.float32, -limit, limit)
    b = jax.random.uniform(kb, (out_f,), jnp.float32, -limit, limit)
    return w, b


def init_critic_params(key, num_inputs):
    ks = jax.random.split(key, 9)
    p = {}
    p["conv1_w"] = _xavier_uniform_conv(ks[0], (64, num_inputs, 4, 2))
    p["conv1_b"] = _uniform_bias(ks[1], num_inputs * 4 * 2, 64)
    p["conv2_w"] = _xavier_uniform_conv(ks[2], (64, 64, 4, 2))
    p["conv2_b"] = _uniform_bias(ks[3], 64 * 4 * 2, 64)
    p["conv3_w"] = _xavier_uniform_conv(ks[4], (3, 64, 1, 1))
    p["conv3_b"] = _uniform_bias(ks[5], 64, 3)
    p["fc1_w"], p["fc1_b"] = _linear_init(ks[6], 120, 256)   # state2
    p["fc2_w"], p["fc2_b"] = _linear_init(ks[7], 256, 64)    # state3
    ow, _ = _linear_init(ks[8], 64, 1)                       # output
    p["out_w"] = ow * 0.1                                    # weight.data.mul_(0.1)
    p["out_b"] = jnp.zeros((1,), jnp.float32)                # bias.data.mul_(0.0)
    return p


# ----------------------------------------------------------------------------
# Pure-JAX reference (for numerical verification of the folded kernel)
# ----------------------------------------------------------------------------
def critic_forward_reference(params, state0, state1):
    x = _conv_stack(params, state0)
    b = x.shape[0]
    x = x.reshape(b, -1)
    x = jnp.concatenate([x, state1], axis=1)
    x = jax.nn.relu(jnp.dot(x, params["fc1_w"].T, precision=_HIGH) + params["fc1_b"])
    x = jax.nn.relu(jnp.dot(x, params["fc2_w"].T, precision=_HIGH) + params["fc2_b"])
    return jnp.dot(x, params["out_w"].T, precision=_HIGH) + params["out_b"]


# ----------------------------------------------------------------------------
if __name__ == "__main__":
    # Shapes chosen so flattened conv features + extra features == 120,
    # as required by nn.Linear(120, 256):
    #   (B, 4, 12, 8) -conv(4,2)-> (B,64,9,7) -conv(4,2)-> (B,64,6,6)
    #   -conv(1x1)-> (B,3,6,6) -> flatten 108  ;  state[1]: (B, 12)  => 120
    B, C_IN, H, W = 2, 4, 12, 8
    EXTRA = 120 - 3 * (H - 6) * (W - 2)

    key = jax.random.PRNGKey(0)
    k_params, k_s0, k_s1 = jax.random.split(key, 3)

    params = init_critic_params(k_params, C_IN)
    fused = fold_critic_params(params, (C_IN, H, W))   # one-time fold

    state0 = jax.random.normal(k_s0, (B, C_IN, H, W), jnp.float32)
    state1 = jax.random.normal(k_s1, (B, EXTRA), jnp.float32)

    values = critic_forward(fused, state0, state1)
    jax.block_until_ready(values)
    assert values.shape == (B, 1), values.shape

    ref = critic_forward_reference(params, state0, state1)
    assert jnp.allclose(values, ref, rtol=2e-3, atol=2e-3), (values, ref)

    print("KERNEL_OK")
</pallas_src>

<mosaic_0001>
module attributes {stable_mosaic.version = 11 : i64} {
  func.func @_critic_kernel(%arg0: i32, %arg1: memref<8x384xf32, #tpu.memory_space<vmem>>, %arg2: memref<8x12xf32, #tpu.memory_space<vmem>>, %arg3: memref<384x256xf32, #tpu.memory_space<vmem>>, %arg4: memref<12x256xf32, #tpu.memory_space<vmem>>, %arg5: memref<1x256xf32, #tpu.memory_space<vmem>>, %arg6: memref<256x128xf32, #tpu.memory_space<vmem>>, %arg7: memref<1x128xf32, #tpu.memory_space<vmem>>, %arg8: memref<128x128xf32, #tpu.memory_space<vmem>>, %arg9: memref<1x128xf32, #tpu.memory_space<vmem>>, %arg10: memref<8x128xf32, #tpu.memory_space<vmem>>) attributes {dimension_semantics = [#tpu.dimension_semantics<parallel>], iteration_bounds = array<i64: 1>, scalar_prefetch = 0 : i64, scratch_operands = 0 : i64, tpu.core_type = #tpu.core_type<tc>, window_params = [{transform_indices = @transform_0, window_bounds = array<i64: 8, 384>}, {transform_indices = @transform_1, window_bounds = array<i64: 8, 12>}, {pipeline_mode = #tpu.pipeline_mode<synchronous>, transform_indices = @transform_2, window_bounds = array<i64: 384, 256>}, {pipeline_mode = #tpu.pipeline_mode<synchronous>, transform_indices = @transform_3, window_bounds = array<i64: 12, 256>}, {pipeline_mode = #tpu.pipeline_mode<synchronous>, transform_indices = @transform_4, window_bounds = array<i64: 1, 256>}, {pipeline_mode = #tpu.pipeline_mode<synchronous>, transform_indices = @transform_5, window_bounds = array<i64: 256, 128>}, {pipeline_mode = #tpu.pipeline_mode<synchronous>, transform_indices = @transform_6, window_bounds = array<i64: 1, 128>}, {pipeline_mode = #tpu.pipeline_mode<synchronous>, transform_indices = @transform_7, window_bounds = array<i64: 128, 128>}, {pipeline_mode = #tpu.pipeline_mode<synchronous>, transform_indices = @transform_8, window_bounds = array<i64: 1, 128>}, {transform_indices = @transform_9, window_bounds = array<i64: 8, 128>}]} {
    %c0 = arith.constant 0 : index
    %c0_0 = arith.constant 0 : index
    %0 = vector.load %arg1[%c0, %c0_0] : memref<8x384xf32, #tpu.memory_space<vmem>>, vector<8x384xf32>
    %c0_1 = arith.constant 0 : index
    %c0_2 = arith.constant 0 : index
    %1 = vector.load %arg3[%c0_1, %c0_2] : memref<384x256xf32, #tpu.memory_space<vmem>>, vector<384x256xf32>
    %cst = arith.constant dense<0.000000e+00> : vector<8x256xf32>
    %2 = tpu.matmul %0, %1, %cst {dimension_numbers = #tpu.dot_dimension_numbers<[1], [0], [0], [1], [0, 0, 1, 1], [], []>} : vector<8x384xf32>, vector<384x256xf32>, vector<8x256xf32> -> vector<8x256xf32>
    %c0_3 = arith.constant 0 : index
    %c0_4 = arith.constant 0 : index
    %3 = vector.load %arg2[%c0_3, %c0_4] : memref<8x12xf32, #tpu.memory_space<vmem>>, vector<8x12xf32>
    %c0_5 = arith.constant 0 : index
    %c0_6 = arith.constant 0 : index
    %4 = vector.load %arg4[%c0_5, %c0_6] : memref<12x256xf32, #tpu.memory_space<vmem>>, vector<12x256xf32>
    %cst_7 = arith.constant dense<0.000000e+00> : vector<8x256xf32>
    %5 = tpu.matmul %3, %4, %cst_7 {dimension_numbers = #tpu.dot_dimension_numbers<[1], [0], [0], [1], [0, 0, 1, 1], [], []>} : vector<8x12xf32>, vector<12x256xf32>, vector<8x256xf32> -> vector<8x256xf32>
    %6 = arith.addf %2, %5 : vector<8x256xf32>
    %c0_8 = arith.constant 0 : index
    %c0_9 = arith.constant 0 : index
    %7 = vector.load %arg5[%c0_8, %c0_9] : memref<1x256xf32, #tpu.memory_space<vmem>>, vector<1x256xf32>
    %8 = vector.broadcast %7 : vector<1x256xf32> to vector<8x256xf32>
    %9 = arith.addf %6, %8 : vector<8x256xf32>
    %cst_10 = arith.constant 0.000000e+00 : f32
    %10 = vector.broadcast %cst_10 : f32 to vector<8x256xf32>
    %11 = arith.maximumf %9, %10 : vector<8x256xf32>
    %c0_11 = arith.constant 0 : index
    %c0_12 = arith.constant 0 : index
    %12 = vector.load %arg6[%c0_11, %c0_12] : memref<256x128xf32, #tpu.memory_space<vmem>>, vector<256x128xf32>
    %cst_13 = arith.constant dense<0.000000e+00> : vector<8x128xf32>
    %13 = tpu.matmul %11, %12, %cst_13 {dimension_numbers = #tpu.dot_dimension_numbers<[1], [0], [0], [1], [0, 0, 1, 1], [], []>} : vector<8x256xf32>, vector<256x128xf32>, vector<8x128xf32> -> vector<8x128xf32>
    %c0_14 = arith.constant 0 : index
    %c0_15 = arith.constant 0 : index
    %14 = vector.load %arg7[%c0_14, %c0_15] : memref<1x128xf32, #tpu.memory_space<vmem>>, vector<1x128xf32>
    %15 = vector.broadcast %14 : vector<1x128xf32> to vector<8x128xf32>
    %16 = arith.addf %13, %15 : vector<8x128xf32>
    %cst_16 = arith.constant 0.000000e+00 : f32
    %17 = vector.broadcast %cst_16 : f32 to vector<8x128xf32>
    %18 = arith.maximumf %16, %17 : vector<8x128xf32>
    %c0_17 = arith.constant 0 : index
    %c0_18 = arith.constant 0 : index
    %19 = vector.load %arg8[%c0_17, %c0_18] : memref<128x128xf32, #tpu.memory_space<vmem>>, vector<128x128xf32>
    %cst_19 = arith.constant dense<0.000000e+00> : vector<8x128xf32>
    %20 = tpu.matmul %18, %19, %cst_19 {dimension_numbers = #tpu.dot_dimension_numbers<[1], [0], [0], [1], [0, 0, 1, 1], [], []>} : vector<8x128xf32>, vector<128x128xf32>, vector<8x128xf32> -> vector<8x128xf32>
    %c0_20 = arith.constant 0 : index
    %c0_21 = arith.constant 0 : index
    %21 = vector.load %arg9[%c0_20, %c0_21] : memref<1x128xf32, #tpu.memory_space<vmem>>, vector<1x128xf32>
    %22 = vector.broadcast %21 : vector<1x128xf32> to vector<8x128xf32>
    %23 = arith.addf %20, %22 : vector<8x128xf32>
    %c0_22 = arith.constant 0 : index
    %c0_23 = arith.constant 0 : index
    %24 = vector.load %arg10[%c0_22, %c0_23] : memref<8x128xf32, #tpu.memory_space<vmem>>, vector<8x128xf32>
    tpu.vector_store %arg10[%c0_22, %c0_23], %23 {strides = array<i32>} : memref<8x128xf32, #tpu.memory_space<vmem>>, vector<8x128xf32>,
    return
  }
  func.func @transform_0(%arg0: i32) -> (i32, i32) {
    %c0_i32 = arith.constant 0 : i32
    %c0_i32_0 = arith.constant 0 : i32
    return %arg0, %c0_i32 : i32, i32
  }
  func.func @transform_1(%arg0: i32) -> (i32, i32) {
    %c0_i32 = arith.constant 0 : i32
    %c0_i32_0 = arith.constant 0 : i32
    return %arg0, %c0_i32 : i32, i32
  }
  func.func @transform_2(%arg0: i32) -> (i32, i32) {
    %c0_i32 = arith.constant 0 : i32
    %c0_i32_0 = arith.constant 0 : i32
    %c0_i32_1 = arith.constant 0 : i32
    return %c0_i32, %c0_i32_0 : i32, i32
  }
  func.func @transform_3(%arg0: i32) -> (i32, i32) {
    %c0_i32 = arith.constant 0 : i32
    %c0_i32_0 = arith.constant 0 : i32
    %c0_i32_1 = arith.constant 0 : i32
    return %c0_i32, %c0_i32_0 : i32, i32
  }
  func.func @transform_4(%arg0: i32) -> (i32, i32) {
    %c0_i32 = arith.constant 0 : i32
    %c0_i32_0 = arith.constant 0 : i32
    %c0_i32_1 = arith.constant 0 : i32
    return %c0_i32, %c0_i32_0 : i32, i32
  }
  func.func @transform_5(%arg0: i32) -> (i32, i32) {
    %c0_i32 = arith.constant 0 : i32
    %c0_i32_0 = arith.constant 0 : i32
    %c0_i32_1 = arith.constant 0 : i32
    return %c0_i32, %c0_i32_0 : i32, i32
  }
  func.func @transform_6(%arg0: i32) -> (i32, i32) {
    %c0_i32 = arith.constant 0 : i32
    %c0_i32_0 = arith.constant 0 : i32
    %c0_i32_1 = arith.constant 0 : i32
    return %c0_i32, %c0_i32_0 : i32, i32
  }
  func.func @transform_7(%arg0: i32) -> (i32, i32) {
    %c0_i32 = arith.constant 0 : i32
    %c0_i32_0 = arith.constant 0 : i32
    %c0_i32_1 = arith.constant 0 : i32
    return %c0_i32, %c0_i32_0 : i32, i32
  }
  func.func @transform_8(%arg0: i32) -> (i32, i32) {
    %c0_i32 = arith.constant 0 : i32
    %c0_i32_0 = arith.constant 0 : i32
    %c0_i32_1 = arith.constant 0 : i32
    return %c0_i32, %c0_i32_0 : i32, i32
  }
  func.func @transform_9(%arg0: i32) -> (i32, i32) {
    %c0_i32 = arith.constant 0 : i32
    %c0_i32_0 = arith.constant 0 : i32
    return %arg0, %c0_i32 : i32, i32
  }
}

</mosaic_0001>

<bundles_post_ra>
// kernel: _critic_forward_impl.1
= control target key start
LH: loop header
LB: loop body
LE: loop exit
PB: predicated region body
PF: predicated region fallthrough
CT: control target
= control target key end

     0   :  { %14 = vsyncpa [#allocation3], 0  ;;  %s1154_s0 = inlined_call_operand.vmem [shape: f32[8,384], index: 0, kind: input, shape index: {}]   ;;  %s1155_s1 = inlined_call_operand.vmem [shape: f32[8,12], index: 1, kind: input, shape index: {}]   ;;  %s1156_s2 = inlined_call_operand.hbm [shape: f32[384,256], index: 2, kind: input, shape index: {}]   ;;  %s1157_s3 = inlined_call_operand.vmem [shape: f32[12,256], index: 3, kind: input, shape index: {}]   ;;  %s1158_s4 = inlined_call_operand.vmem [shape: f32[1,256], index: 4, kind: input, shape index: {}]   ;;  %s1159_s5 = inlined_call_operand.vmem [shape: f32[256,128], index: 5, kind: input, shape index: {}]   ;;  %s1160_s6 = inlined_call_operand.vmem [shape: f32[1,128], index: 6, kind: input, shape index: {}]   ;;  %s1161_s7 = inlined_call_operand.hbm [shape: f32[128,128], index: 7, kind: input, shape index: {}]   ;;  %s1162_s8 = inlined_call_operand.vmem [shape: f32[1,128], index: 8, kind: input, shape index: {}]   ;;  %s1163_s9 = inlined_call_operand.vmem [shape: f32[8,128], index: 9, kind: output, shape index: {}]  }
   0x1   :  { %15 = vsyncpa [#allocation5], 0  ;;  %s926_s30 = smov [#allocation2]   ;;  %s878_s13 = scalar_lea.hbm %s1156_s2, 12288 }
   0x2   :  { %s25_s10 = sshll.u32 %s926_s30, 4  ;;  %p879_p0 = scmp.ne.s32.totalorder %s1156_s2, %s878_s13  ;;  %s26_s10 = int_to_ptr.vmem [resolvable:$true] %s25_s10 }
   0x3   :  { %p882_p1 = scmp.lt.u32.totalorder %s878_s13, %s1156_s2 }
   0x5   :  { %p884_p2 = pnand %p882_p1, %p879_p0 }
   0x7   :  { %887 = shalt.err (!%p884_p2)
}
   0x8   :  { %s888_s18 = scalar_lea.vmem %s26_s10, 12288  ;;  %p893_p4 = scmp.lt.s32.totalorder %s26_s10, %s26_s10 }
   0x9   :  { %p889_p3 = scmp.ne.s32.totalorder %s26_s10, %s888_s18  ;;  %p894_p5 = scmp.lt.s32.totalorder %s888_s18, %s888_s18 }
   0xb   :  { %p895_p6 = por %p894_p5, %p893_p4 }
   0xd   :  { %p896_p7 = pnand %p895_p6, %p889_p3 }
   0xf   :  { %899 = shalt.err (!%p896_p7)
}
  0x10   :  { %s927_s19 = smov 256   ;;  %s928_s20 = smov 16  }
  0x11   :  { %31 = dma.hbm_to_vmem [thread:$0]  %s1156_s2, 12288, %s26_s10, [#allocation3], %s927_s19, %s927_s19, %s928_s20  }
  0x12   :  { %s929_s23 = smov [#allocation4]   ;;  %s900_s27 = scalar_lea.hbm %s1161_s7, 2048 }
  0x13   :  { %s45_s24 = sshll.u32 %s929_s23, 4  ;;  %p901_p8 = scmp.ne.s32.totalorder %s1161_s7, %s900_s27  ;;  %s46_s24 = int_to_ptr.vmem [resolvable:$true] %s45_s24 }
  0x14   :  { %p904_p9 = scmp.lt.u32.totalorder %s900_s27, %s1161_s7 }
  0x16   :  { %p906_p10 = pnand %p904_p9, %p901_p8 }
  0x18   :  { %909 = shalt.err (!%p906_p10)
}
  0x19   :  { %s910_s12 = scalar_lea.vmem %s46_s24, 2048  ;;  %p915_p12 = scmp.lt.s32.totalorder %s46_s24, %s46_s24 }
  0x1a   :  { %p911_p11 = scmp.ne.s32.totalorder %s46_s24, %s910_s12  ;;  %p916_p13 = scmp.lt.s32.totalorder %s910_s12, %s910_s12 }
  0x1c   :  { %p917_p0 = por %p916_p13, %p915_p12 }
  0x1e   :  { %p918_p1 = pnand %p917_p0, %p911_p11 }
  0x20   :  { %921 = shalt.err (!%p918_p1)
}
  0x21   :  { %s930_s2 = smov 128   ;;  %s931_s10 = smov 8  }
  0x22   :  { %51 = dma.hbm_to_vmem [thread:$0]  %s1161_s7, 2048, %s46_s24, [#allocation5], %s930_s2, %s930_s2, %s931_s10  }
  0x23   :  { %922 = dma.done.wait [#allocation3], 12288  }
  0x24   :  { %923 = vsyncadd [#allocation3], 4294955008 }
  0x25   :  { %924 = dma.done.wait [#allocation5], 2048  }
  0x26   :  { %925 = vsyncadd [#allocation5], 4294965248  ;;  %v932_v0 = vmov 0.0   ;;  %v64_v1 = vld [vmem:[#allocation2 + $0x8] sm:$0xff]  ;;  %v66_v2 = vld [vmem:[#allocation2 + $0x18] sm:$0xff]  ;;  %vm168_vm0 = vcmask 1043456  }
  0x27   :  { %239 = vmatprep.mubr.f32.mxu1 %v932_v0  ;;  %v63_v3 = vld [vmem:[#allocation2] sm:$0xff]  ;;  %v712_v4 = vpack.c.bf16 %v66_v2, %v64_v1  ;;  %v65_v5 = vld [vmem:[#allocation2 + $0x10] sm:$0xff]  ;;  %v68_v6 = vld [vmem:[#allocation2 + $0x28] sm:$0xff]  ;;  %vm933_vm1 = vmmov 1   ;;  %vm164_vm3 = vcmask 97280   ;;  %vm935_vm4 = vmmov 0  }
  0x28   :  { %v70_v7 = vld [vmem:[#allocation2 + $0x38] sm:$0xff]  ;;  %v714_v8 = vpack.c.bf16 %v65_v5, %v63_v3  ;;  %v67_v10 = vld [vmem:[#allocation2 + $0x20] sm:$0xff]  ;;  %v69_v11 = vld [vmem:[#allocation2 + $0x30] sm:$0xff] }
  0x29   :  { %v716_v9 = vpack.c.bf16 %v70_v7, %v68_v6  ;;  %v72_v12 = vld [vmem:[#allocation2 + $0x48] sm:$0xff]  ;;  %713 = vmatprep.subr.bf16.mxu0 %v712_v4  ;;  %v74_v13 = vld [vmem:[#allocation2 + $0x58] sm:$0xff]  ;;  %v718_v14 = vpack.c.bf16 %v69_v11, %v67_v10  ;;  %v71_v16 = vld [vmem:[#allocation2 + $0x40] sm:$0xff] }
  0x2a   :  { %715 = vmatpush1.bf16.msra.mxu0 %v714_v8  ;;  %v720_v15 = vpack.c.bf16 %v74_v13, %v72_v12  ;;  %v73_v17 = vld [vmem:[#allocation2 + $0x50] sm:$0xff]  ;;  %v76_v18 = vld [vmem:[#allocation2 + $0x68] sm:$0xff]  ;;  %v78_v19 = vld [vmem:[#allocation2 + $0x78] sm:$0xff] }
  0x2b   :  { %717 = vmatprep.subr.bf16.mxu0 %v716_v9  ;;  %v722_v20 = vpack.c.bf16 %v73_v17, %v71_v16  ;;  %v724_v21 = vpack.c.bf16 %v78_v19, %v76_v18  ;;  %v75_v22 = vld [vmem:[#allocation2 + $0x60] sm:$0xff]  ;;  %v77_v23 = vld [vmem:[#allocation2 + $0x70] sm:$0xff]  ;;  %v80_v24 = vld [vmem:[#allocation2 + $0x88] sm:$0xff] }
  0x2c   :  { %v82_v25 = vld [vmem:[#allocation2 + $0x98] sm:$0xff]  ;;  %v726_v26 = vpack.c.bf16 %v77_v23, %v75_v22  ;;  %v79_v28 = vld [vmem:[#allocation2 + $0x80] sm:$0xff]  ;;  %v81_v29 = vld [vmem:[#allocation2 + $0x90] sm:$0xff] }
  0x2d   :  { %v728_v27 = vpack.c.bf16 %v82_v25, %v80_v24  ;;  %v84_v30 = vld [vmem:[#allocation2 + $0xa8] sm:$0xff]  ;;  %v86_v31 = vld [vmem:[#allocation2 + $0xb8] sm:$0xff]  ;;  %v730_v32 = vpack.c.bf16 %v81_v29, %v79_v28  ;;  %v83_v34 = vld [vmem:[#allocation2 + $0xa0] sm:$0xff] }
  0x2e   :  { %719 = vmatpush1.bf16.msra.mxu0 %v718_v14  ;;  %v732_v33 = vpack.c.bf16 %v86_v31, %v84_v30  ;;  %v85_v35 = vld [vmem:[#allocation2 + $0xb0] sm:$0xff]  ;;  %v88_v36 = vld [vmem:[#allocation2 + $0xc8] sm:$0xff]  ;;  %v90_v37 = vld [vmem:[#allocation2 + $0xd8] sm:$0xff] }
  0x2f   :  { %721 = vmatprep.subr.bf16.mxu0 %v720_v15  ;;  %v734_v38 = vpack.c.bf16 %v85_v35, %v83_v34  ;;  %v736_v39 = vpack.c.bf16 %v90_v37, %v88_v36  ;;  %v87_v40 = vld [vmem:[#allocation2 + $0xc0] sm:$0xff]  ;;  %v89_v41 = vld [vmem:[#allocation2 + $0xd0] sm:$0xff]  ;;  %v61_v42 = vld [vmem:[%s1154_s0 + $0x8] sm:$0xff] }
  0x30   :  { %v92_v43 = vld [vmem:[#allocation2 + $0xe8] sm:$0xff]  ;;  %v94_v44 = vld [vmem:[#allocation2 + $0xf8] sm:$0xff]  ;;  %310 = vmatprep.mubr.f32.mxu0 %v61_v42  ;;  %v738_v45 = vpack.c.bf16 %v89_v41, %v87_v40  ;;  %v91_v47 = vld [vmem:[#allocation2 + $0xe0] sm:$0xff] }
  0x31   :  { %v740_v46 = vpack.c.bf16 %v94_v44, %v92_v43  ;;  %v93_v48 = vld [vmem:[#allocation2 + $0xf0] sm:$0xff]  ;;  %v96_v49 = vld [vmem:[#allocation2 + $0x108] sm:$0xff]  ;;  %v98_v50 = vld [vmem:[#allocation2 + $0x118] sm:$0xff] }
  0x32   :  { %723 = vmatpush1.bf16.msra.mxu0 %v722_v20  ;;  %v742_v51 = vpack.c.bf16 %v93_v48, %v91_v47  ;;  %v744_v52 = vpack.c.bf16 %v98_v50, %v96_v49  ;;  %v95_v53 = vld [vmem:[#allocation2 + $0x100] sm:$0xff]  ;;  %v97_v54 = vld [vmem:[#allocation2 + $0x110] sm:$0xff]  ;;  %v100_v55 = vld [vmem:[#allocation2 + $0x128] sm:$0xff] }
  0x33   :  { %725 = vmatprep.subr.bf16.mxu0 %v724_v21  ;;  %v102_v56 = vld [vmem:[#allocation2 + $0x138] sm:$0xff]  ;;  %v161_v57 = vld [vmem:[%s1157_s3 + $0x8] sm:$0xff]  ;;  %vm1020_vm2 = vmpackc.low %vm168_vm0, %vm933_vm1  ;;  %v746_v60 = vpack.c.bf16 %v97_v54, %v95_v53 }
  0x34   :  { %v163_v58 = vld [vmem:[%s1157_s3 + $0x18] sm:$0xf]  ;;  %v160_v62 = vld [vmem:[%s1157_s3] sm:$0xff]  ;;  %v162_v63 = vld [vmem:[%s1157_s3 + $0x10] sm:$0xf]  ;;  %v748_v1 = vpack.c.bf16 %v102_v56, %v100_v55 }
  0x35   :  { %v706_v61 = vpack.c.bf16 %v163_v58, %v161_v57  ;;  %v99_v2 = vld [vmem:[#allocation2 + $0x120] sm:$0xff]  ;;  %v101_v3 = vld [vmem:[#allocation2 + $0x130] sm:$0xff]  ;;  %v104_v4 = vld [vmem:[#allocation2 + $0x148] sm:$0xff]  ;;  %v709_v5 = vpack.c.bf16 %v162_v63, %v160_v62 }
  0x36   :  { %727 = vmatpush1.bf16.msra.mxu0 %v726_v26  ;;  %v106_v6 = vld [vmem:[#allocation2 + $0x158] sm:$0xff]  ;;  %v159_v7 = vld [vmem:[%s1155_s1] sm:$0xff]  ;;  %v105_v10 = vld [vmem:[#allocation2 + $0x150] sm:$0xff]  ;;  %v750_v14 = vpack.c.bf16 %v101_v3, %v99_v2 }
  0x37   :  { %729 = vmatprep.subr.bf16.mxu0 %v728_v27  ;;  %708 = vmatprep.subr.msk.bf16.mxu1 %vm1020_vm2, %v706_v61  ;;  %v420_v8 = vld [vmem:[%s1159_s5 + $0x80] sm:$0xff]  ;;  %v421_v11 = vld [vmem:[%s1159_s5 + $0x88] sm:$0xff]  ;;  %v422_v17 = vld [vmem:[%s1159_s5 + $0x90] sm:$0xff]  ;;  %v752_v20 = vpack.c.bf16 %v106_v6, %v104_v4 }
  0x38   :  { %v103_v9 = vld [vmem:[#allocation2 + $0x140] sm:$0xff]  ;;  %711 = vmatpush1.bf16.msk.msra.mxu1 %vm1020_vm2, %v709_v5  ;;  %v405_v13 = vld [vmem:[%s1159_s5 + $0x8] sm:$0xff]  ;;  %v808_v15 = vpack.c.bf16 %v421_v11, %v420_v8  ;;  %v423_v18 = vld [vmem:[%s1159_s5 + $0x98] sm:$0xff] }
  0x39   :  { %v404_v12 = vld [vmem:[%s1159_s5] sm:$0xff]  ;;  %v406_v19 = vld [vmem:[%s1159_s5 + $0x10] sm:$0xff]  ;;  %v812_v21 = vpack.c.bf16 %v423_v18, %v422_v17  ;;  %v407_v22 = vld [vmem:[%s1159_s5 + $0x18] sm:$0xff]  ;;  %v754_v28 = vpack.c.bf16 %v105_v10, %v103_v9 }
  0x3a   :  { %731 = vmatpush1.bf16.msra.mxu0 %v730_v32  ;;  %v810_v16 = vpack.c.bf16 %v405_v13, %v404_v12  ;;  %v424_v23 = vld [vmem:[%s1159_s5 + $0xa0] sm:$0xff]  ;;  %v425_v24 = vld [vmem:[%s1159_s5 + $0xa8] sm:$0xff]  ;;  %v110_v26 = vld [vmem:[#allocation2 + $0x178] sm:$0xff]  ;;  %809 = vmatprep.subr.bf16.mxu1 %v808_v15  ;;  %v814_v27 = vpack.c.bf16 %v407_v22, %v406_v19 }
  0x3b   :  { %733 = vmatprep.subr.bf16.mxu0 %v732_v33  ;;  %v108_v25 = vld [vmem:[#allocation2 + $0x168] sm:$0xff]  ;;  %616 = vmatmul.mubr.msk.f32.vlgmr.msra.gmra.mrb[0].mxu1 %vm164_vm3, %v159_v7  ;;  %v107_v29 = vld [vmem:[#allocation2 + $0x160] sm:$0xff]  ;;  %v816_v30 = vpack.c.bf16 %v425_v24, %v424_v23  ;;  %v109_v34 = vld [vmem:[#allocation2 + $0x170] sm:$0xff] }
  0x3c   :  { %811 = vmatpush3.bf16.msra.mxu1 %v810_v16  ;;  %v408_v31 = vld [vmem:[%s1159_s5 + $0x20] sm:$0xff]  ;;  %v409_v32 = vld [vmem:[%s1159_s5 + $0x28] sm:$0xff]  ;;  %v756_v33 = vpack.c.bf16 %v110_v26, %v108_v25  ;;  %v426_v35 = vld [vmem:[%s1159_s5 + $0xb0] sm:$0xff]  ;;  %v758_v40 = vpack.c.bf16 %v109_v34, %v107_v29 }
  0x3d   :  { %813 = vmatprep.subr.bf16.mxu1 %v812_v21  ;;  %v427_v36 = vld [vmem:[%s1159_s5 + $0xb8] sm:$0xff]  ;;  %v112_v37 = vld [vmem:[#allocation2 + $0x188] sm:$0xff]  ;;  %v111_v41 = vld [vmem:[#allocation2 + $0x180] sm:$0xff] }
  0x3e   :  { %735 = vmatpush1.bf16.msra.mxu0 %v734_v38  ;;  %v114_v38 = vld [vmem:[#allocation2 + $0x198] sm:$0xff]  ;;  %v820_v42 = vpack.c.bf16 %v427_v36, %v426_v35  ;;  %v410_v43 = vld [vmem:[%s1159_s5 + $0x30] sm:$0xff]  ;;  %v428_v47 = vld [vmem:[%s1159_s5 + $0xc0] sm:$0xff] }
  0x3f   :  { %737 = vmatprep.subr.bf16.mxu0 %v736_v39  ;;  %v818_v39 = vpack.c.bf16 %v409_v32, %v408_v31  ;;  %v411_v44 = vld [vmem:[%s1159_s5 + $0x38] sm:$0xff]  ;;  %v429_v48 = vld [vmem:[%s1159_s5 + $0xc8] sm:$0xff]  ;;  %v115_v53 = vld [vmem:[#allocation2 + $0x1a0] sm:$0xff] }
  0x40   :  { %815 = vmatpush3.bf16.msra.mxu1 %v814_v27  ;;  %v116_v49 = vld [vmem:[#allocation2 + $0x1a8] sm:$0xff]  ;;  %v118_v50 = vld [vmem:[#allocation2 + $0x1b8] sm:$0xff]  ;;  %v824_v54 = vpack.c.bf16 %v429_v48, %v428_v47  ;;  %v412_v55 = vld [vmem:[%s1159_s5 + $0x40] sm:$0xff] }
  0x41   :  { %817 = vmatprep.subr.bf16.mxu1 %v816_v30  ;;  %v413_v56 = vld [vmem:[%s1159_s5 + $0x48] sm:$0xff]  ;;  %v764_v57 = vpack.c.bf16 %v118_v50, %v116_v49  ;;  %v117_v58 = vld [vmem:[#allocation2 + $0x1b0] sm:$0xff]  ;;  %v122_v62 = vld [vmem:[#allocation2 + $0x1d8] sm:$0xff] }
  0x42   :  { %739 = vmatpush1.bf16.msra.mxu0 %v738_v45  ;;  %v760_v45 = vpack.c.bf16 %v114_v38, %v112_v37  ;;  %v430_v59 = vld [vmem:[%s1159_s5 + $0xd0] sm:$0xff]  ;;  %v120_v61 = vld [vmem:[#allocation2 + $0x1c8] sm:$0xff]  ;;  %v826_v63 = vpack.c.bf16 %v413_v56, %v412_v55  ;;  %v415_v4 = vld [vmem:[%s1159_s5 + $0x58] sm:$0xff] }
  0x43   :  { %741 = vmatprep.subr.bf16.mxu0 %v740_v46  ;;  %v113_v46 = vld [vmem:[#allocation2 + $0x190] sm:$0xff]  ;;  %v768_v5 = vpack.c.bf16 %v122_v62, %v120_v61  ;;  %v119_v6 = vld [vmem:[#allocation2 + $0x1c0] sm:$0xff]  ;;  %v124_v8 = vld [vmem:[#allocation2 + $0x1e8] sm:$0xff] }
  0x44   :  { %819 = vmatpush3.bf16.msra.mxu1 %v818_v39  ;;  %v414_v3 = vld [vmem:[%s1159_s5 + $0x50] sm:$0xff]  ;;  %v126_v9 = vld [vmem:[#allocation2 + $0x1f8] sm:$0xff]  ;;  %v123_v13 = vld [vmem:[#allocation2 + $0x1e0] sm:$0xff] }
  0x45   :  { %821 = vmatprep.subr.bf16.mxu1 %v820_v42  ;;  %v121_v7 = vld [vmem:[#allocation2 + $0x1d0] sm:$0xff]  ;;  %v830_v10 = vpack.c.bf16 %v415_v4, %v414_v3  ;;  %v772_v12 = vpack.c.bf16 %v126_v9, %v124_v8  ;;  %v128_v15 = vld [vmem:[#allocation2 + $0x208] sm:$0xff]  ;;  %v130_v16 = vld [vmem:[#allocation2 + $0x218] sm:$0xff] }
  0x46   :  { %743 = vmatpush1.bf16.msra.mxu0 %v742_v51  ;;  %v822_v51 = vpack.c.bf16 %v411_v44, %v410_v43  ;;  %v770_v11 = vpack.c.bf16 %v121_v7, %v119_v6  ;;  %v776_v18 = vpack.c.bf16 %v130_v16, %v128_v15  ;;  %v127_v19 = vld [vmem:[#allocation2 + $0x200] sm:$0xff]  ;;  %v132_v21 = vld [vmem:[#allocation2 + $0x228] sm:$0xff]  ;;  %v134_v22 = vld [vmem:[#allocation2 + $0x238] sm:$0xff]  ;;  %v934_v15 = vmov 0.0|0.0  }
  0x47   :  { %745 = vmatprep.subr.bf16.mxu0 %v744_v52  ;;  %v762_v52 = vpack.c.bf16 %v113_v46, %v111_v41  ;;  %v60_v23 = vld [vmem:[%s1154_s0] sm:$0xff]  ;;  %v780_v25 = vpack.c.bf16 %v134_v22, %v132_v21  ;;  %v133_v27 = vld [vmem:[#allocation2 + $0x230] sm:$0xff]  ;;  %v138_v29 = vld [vmem:[#allocation2 + $0x258] sm:$0xff] }
  0x48   :  { %823 = vmatpush3.bf16.msra.mxu1 %v822_v51  ;;  %v131_v26 = vld [vmem:[#allocation2 + $0x220] sm:$0xff]  ;;  %v140_v34 = vld [vmem:[#allocation2 + $0x268] sm:$0xff]  ;;  %v142_v35 = vld [vmem:[#allocation2 + $0x278] sm:$0xff] }
  0x49   :  { %825 = vmatprep.subr.bf16.mxu1 %v824_v54  ;;  %v782_v30 = vpack.c.bf16 %v133_v27, %v131_v26  ;;  %v135_v32 = vld [vmem:[#allocation2 + $0x240] sm:$0xff]  ;;  %v788_v37 = vpack.c.bf16 %v142_v35, %v140_v34  ;;  %v141_v39 = vld [vmem:[#allocation2 + $0x270] sm:$0xff]  ;;  %v146_v41 = vld [vmem:[#allocation2 + $0x298] sm:$0xff] }
  0x4a   :  { %747 = vmatpush1.bf16.msra.mxu0 %v746_v60  ;;  %v431_v60 = vld [vmem:[%s1159_s5 + $0xd8] sm:$0xff]  ;;  %v139_v38 = vld [vmem:[#allocation2 + $0x260] sm:$0xff]  ;;  %v148_v46 = vld [vmem:[#allocation2 + $0x2a8] sm:$0xff] }
  0x4b   :  { %749 = vmatprep.subr.bf16.mxu0 %v748_v1  ;;  %v766_v1 = vpack.c.bf16 %v117_v58, %v115_v53  ;;  %v828_v2 = vpack.c.bf16 %v431_v60, %v430_v59  ;;  %v790_v42 = vpack.c.bf16 %v141_v39, %v139_v38  ;;  %v143_v44 = vld [vmem:[#allocation2 + $0x280] sm:$0xff]  ;;  %v150_v47 = vld [vmem:[#allocation2 + $0x2b8] sm:$0xff]  ;;  %v149_v51 = vld [vmem:[#allocation2 + $0x2b0] sm:$0xff] }
  0x4c   :  { %827 = vmatpush3.bf16.msra.mxu1 %v826_v63  ;;  %v796_v49 = vpack.c.bf16 %v150_v47, %v148_v46  ;;  %v147_v50 = vld [vmem:[#allocation2 + $0x2a0] sm:$0xff]  ;;  %v154_v53 = vld [vmem:[#allocation2 + $0x2d8] sm:$0xff]  ;;  %v156_v58 = vld [vmem:[#allocation2 + $0x2e8] sm:$0xff] }
  0x4d   :  { %829 = vmatprep.subr.bf16.mxu1 %v828_v2  ;;  %v798_v54 = vpack.c.bf16 %v149_v51, %v147_v50  ;;  %v151_v56 = vld [vmem:[#allocation2 + $0x2c0] sm:$0xff]  ;;  %v158_v59 = vld [vmem:[#allocation2 + $0x2f8] sm:$0xff]  ;;  %v157_v63 = vld [vmem:[#allocation2 + $0x2f0] sm:$0xff] }
  0x4e   :  { %751 = vmatpush1.bf16.msra.mxu0 %v750_v14  ;;  %v125_v14 = vld [vmem:[#allocation2 + $0x1f0] sm:$0xff]  ;;  %v804_v61 = vpack.c.bf16 %v158_v59, %v156_v58  ;;  %v155_v62 = vld [vmem:[#allocation2 + $0x2e0] sm:$0xff]  ;;  %v433_v4 = vld [vmem:[%s1159_s5 + $0xe8] sm:$0xff] }
  0x4f   :  { %753 = vmatprep.subr.bf16.mxu0 %v752_v20  ;;  %v774_v17 = vpack.c.bf16 %v125_v14, %v123_v13  ;;  %v129_v20 = vld [vmem:[#allocation2 + $0x210] sm:$0xff]  ;;  %v432_v3 = vld [vmem:[%s1159_s5 + $0xe0] sm:$0xff]  ;;  %v417_v7 = vld [vmem:[%s1159_s5 + $0x68] sm:$0xff] }
  0x50   :  { %831 = vmatpush3.bf16.msra.mxu1 %v830_v10  ;;  %v778_v24 = vpack.c.bf16 %v129_v20, %v127_v19  ;;  %v62_v2 = vld [vmem:[%s1154_s0 + $0x10] sm:$0xff]  ;;  %v416_v6 = vld [vmem:[%s1159_s5 + $0x60] sm:$0xff]  ;;  %v435_v10 = vld [vmem:[%s1159_s5 + $0xf8] sm:$0xff] }
  0x51   :  { %v834_v8 = vpack.c.bf16 %v417_v7, %v416_v6  ;;  %v434_v9 = vld [vmem:[%s1159_s5 + $0xf0] sm:$0xff]  ;;  %v419_v13 = vld [vmem:[%s1159_s5 + $0x78] sm:$0xff]  ;;  %v388_v21 = vld [vmem:[%s1158_s4] sm:$0x3] }
  0x52   :  { %755 = vmatpush1.bf16.msra.mxu0 %v754_v28  ;;  %v136_v28 = vld [vmem:[#allocation2 + $0x248] sm:$0xff]  ;;  %v518_v39 = vld [vmem:[#allocation4 + $0x20] sm:$0xff] }
  0x53   :  { %757 = vmatprep.subr.bf16.mxu0 %v756_v33  ;;  %v784_v31 = vpack.c.bf16 %v138_v29, %v136_v28  ;;  %v137_v33 = vld [vmem:[#allocation2 + $0x250] sm:$0xff]  ;;  %v523_v46 = vld [vmem:[#allocation4 + $0x48] sm:$0xff]  ;;  %v526_v51 = vld [vmem:[#allocation4 + $0x60] sm:$0xff] }
  0x54   :  { %v786_v36 = vpack.c.bf16 %v137_v33, %v135_v32  ;;  %v617_v58 = vld [vmem:[%s1160_s6] ss:$0 sm:$0xff] }
  0x56   :  { %759 = vmatpush1.bf16.msra.mxu0 %v758_v40  ;;  %v144_v40 = vld [vmem:[#allocation2 + $0x288] sm:$0xff] }
  0x57   :  { %761 = vmatprep.subr.bf16.mxu0 %v760_v45  ;;  %v792_v43 = vpack.c.bf16 %v146_v41, %v144_v40  ;;  %v145_v45 = vld [vmem:[#allocation2 + $0x290] sm:$0xff]  ;;  %v519_v40 = vld [vmem:[#allocation4 + $0x28] sm:$0xff] }
  0x58   :  { %v794_v48 = vpack.c.bf16 %v145_v45, %v143_v44  ;;  %v847_v41 = vpack.c.bf16 %v519_v40, %v518_v39  ;;  %v522_v45 = vld [vmem:[#allocation4 + $0x40] sm:$0xff] }
  0x59   :  { %v853_v47 = vpack.c.bf16 %v523_v46, %v522_v45 }
  0x5a   :  { %763 = vmatpush1.bf16.msra.mxu0 %v762_v52  ;;  %v152_v52 = vld [vmem:[#allocation2 + $0x2c8] sm:$0xff] }
  0x5b   :  { %765 = vmatprep.subr.bf16.mxu0 %v764_v57  ;;  %v800_v55 = vpack.c.bf16 %v154_v53, %v152_v52  ;;  %v153_v57 = vld [vmem:[#allocation2 + $0x2d0] sm:$0xff]  ;;  %v527_v52 = vld [vmem:[#allocation4 + $0x68] sm:$0xff] }
  0x5c   :  { %v802_v60 = vpack.c.bf16 %v153_v57, %v151_v56  ;;  %v859_v53 = vpack.c.bf16 %v527_v52, %v526_v51 }
  0x5e   :  { %767 = vmatpush1.bf16.msra.mxu0 %v766_v1  ;;  %v806_v1 = vpack.c.bf16 %v157_v63, %v155_v62  ;;  %v618_v63 = vld [vmem:[%s1162_s8] ss:$0 sm:$0xff] }
  0x5f   :  { %769 = vmatprep.subr.bf16.mxu0 %v768_v5  ;;  %v832_v5 = vpack.c.bf16 %v433_v4, %v432_v3 }
  0x61   :  { %833 = vmatprep.subr.bf16.mxu1 %v832_v5 }
  0x62   :  { %771 = vmatpush1.bf16.msra.mxu0 %v770_v11  ;;  %835 = vmatpush3.bf16.msra.mxu1 %v834_v8  ;;  %v836_v11 = vpack.c.bf16 %v435_v10, %v434_v9 }
  0x63   :  { %773 = vmatprep.subr.bf16.mxu0 %v772_v12  ;;  %v418_v12 = vld [vmem:[%s1159_s5 + $0x70] sm:$0xff] }
  0x64   :  { %v838_v14 = vpack.c.bf16 %v419_v13, %v418_v12  ;;  %837 = vmatprep.subr.bf16.mxu1 %v836_v11 }
  0x66   :  { %775 = vmatpush1.bf16.msra.mxu0 %v774_v17  ;;  %839 = vmatpush3.bf16.msra.mxu1 %v838_v14 }
  0x67   :  { %777 = vmatprep.subr.bf16.mxu0 %v776_v18  ;;  %840 = vmatprep.subr.bf16.mxu1 %v934_v15  ;;  %v390_v18 = vlaneseq }
  0x69   :  { %311 = vmatmul.mubr.f32.vlgmr.msra.gmra.mrb[0].mxu0 %v60_v23  ;;  %v391_v19 = vshrl.u32 %v390_v18, 7 }
  0x6a   :  { %779 = vmatpush1.bf16.msra.mxu0 %v778_v24  ;;  %381 = vmatprep.mubr.f32.mxu0 %v932_v0 }
  0x6b   :  { %781 = vmatprep.subr.bf16.mxu0 %v780_v25  ;;  %v392_v20 = vsub.s32 0, %v391_v19  ;;  %v396_v22 = vsub.s32 1, %v391_v19 }
  0x6d   :  { %v393_v23 = vrot.slane %v388_v21, %v392_v20  ;;  %v397_v25 = vrot.slane %v388_v21, %v396_v22 }
  0x6e   :  { %783 = vmatpush1.bf16.msra.mxu0 %v782_v30  ;;  %v514_v30 = vld [vmem:[#allocation4] sm:$0xff] }
  0x6f   :  { %785 = vmatprep.subr.bf16.mxu0 %v784_v31  ;;  %v515_v31 = vld [vmem:[#allocation4 + $0x8] sm:$0xff] }
  0x70   :  { %v841_v34 = vpack.c.bf16 %v515_v31, %v514_v30 }
  0x72   :  { %787 = vmatpush1.bf16.msra.mxu0 %v786_v36  ;;  %v516_v36 = vld [vmem:[#allocation4 + $0x10] sm:$0xff] }
  0x73   :  { %789 = vmatprep.subr.bf16.mxu0 %v788_v37  ;;  %v517_v37 = vld [vmem:[#allocation4 + $0x18] sm:$0xff] }
  0x74   :  { %v844_v38 = vpack.c.bf16 %v517_v37, %v516_v36 }
  0x76   :  { %791 = vmatpush1.bf16.msra.mxu0 %v790_v42  ;;  %v520_v42 = vld [vmem:[#allocation4 + $0x30] sm:$0xff] }
  0x77   :  { %793 = vmatprep.subr.bf16.mxu0 %v792_v43  ;;  %v521_v43 = vld [vmem:[#allocation4 + $0x38] sm:$0xff] }
  0x78   :  { %v850_v44 = vpack.c.bf16 %v521_v43, %v520_v42 }
  0x7a   :  { %795 = vmatpush1.bf16.msra.mxu0 %v794_v48  ;;  %v524_v48 = vld [vmem:[#allocation4 + $0x50] sm:$0xff] }
  0x7b   :  { %797 = vmatprep.subr.bf16.mxu0 %v796_v49  ;;  %v525_v49 = vld [vmem:[#allocation4 + $0x58] sm:$0xff] }
  0x7c   :  { %v856_v50 = vpack.c.bf16 %v525_v49, %v524_v48 }
  0x7e   :  { %799 = vmatpush1.bf16.msra.mxu0 %v798_v54  ;;  %v528_v54 = vld [vmem:[#allocation4 + $0x70] sm:$0xff] }
  0x7f   :  { %801 = vmatprep.subr.bf16.mxu0 %v800_v55  ;;  %v529_v55 = vld [vmem:[#allocation4 + $0x78] sm:$0xff] }
  0x80   :  { %v862_v56 = vpack.c.bf16 %v529_v55, %v528_v54 }
  0x82   :  { %803 = vmatpush1.bf16.msra.mxu0 %v802_v60 }
  0x83   :  { %805 = vmatprep.subr.bf16.mxu0 %v804_v61 }
  0x86   :  { %807 = vmatpush1.bf16.msra.mxu0 %v806_v1 }
  0x89   :  { %382 = vmatmul.mubr.f32.vlgmr.msra.gmra.mrb[0].mxu0 %v62_v2 }
 0x10e   :  { %v241_v16 = vpop.f32.mrb[0].mxu1 }
 0x10f   :  { %v243_v17 = vpop.f32.mrb[1].mxu1 }
 0x15c   :  { %v383_v24 = vpop.f32.mrb[0].mxu0 }
 0x15d   :  { %v864_v26 = vadd.f32 %v383_v24, %v241_v16  ;;  %v385_v27 = vpop.f32.mrb[1].mxu0 }
 0x15e   :  { %v865_v28 = vadd.f32 %v385_v27, %v243_v17 }
 0x15f   :  { %v400_v29 = vadd.f32 %v864_v26, %v393_v23 }
 0x160   :  { %v401_v32 = vadd.f32 %v865_v28, %v397_v25 }
 0x161   :  { %v402_v35 = vmax.f32 %v400_v29, 0.0 }
 0x162   :  { %v403_v33 = vmax.f32 %v401_v32, 0.0 }
 0x164   :  { %507 = vmatprep.mubr.f32.mxu1 %v403_v33 }
 0x165   :  { %508 = vmatmul.mubr.f32.vlgmr.msra.gmra.mrb[2].mxu1 %v402_v35 }
 0x166   :  { %842 = vmatpush3.bf16.msra.mxu1 %v841_v34  ;;  %703 = vmatprep.mubr.msk.f32.mxu1 %vm935_vm4, %v932_v0 }
 0x167   :  { %843 = vmatprep.subr.bf16.mxu1 %v934_v15 }
 0x16a   :  { %845 = vmatpush3.bf16.msra.mxu1 %v844_v38 }
 0x16b   :  { %846 = vmatprep.subr.bf16.mxu1 %v934_v15 }
 0x16e   :  { %848 = vmatpush3.bf16.msra.mxu1 %v847_v41 }
 0x16f   :  { %849 = vmatprep.subr.bf16.mxu1 %v934_v15 }
 0x172   :  { %851 = vmatpush3.bf16.msra.mxu1 %v850_v44 }
 0x173   :  { %852 = vmatprep.subr.bf16.mxu1 %v934_v15 }
 0x176   :  { %854 = vmatpush3.bf16.msra.mxu1 %v853_v47 }
 0x177   :  { %855 = vmatprep.subr.bf16.mxu1 %v934_v15 }
 0x17a   :  { %857 = vmatpush3.bf16.msra.mxu1 %v856_v50 }
 0x17b   :  { %858 = vmatprep.subr.bf16.mxu1 %v934_v15 }
 0x17e   :  { %860 = vmatpush3.bf16.msra.mxu1 %v859_v53 }
 0x17f   :  { %861 = vmatprep.subr.bf16.mxu1 %v934_v15 }
 0x182   :  { %863 = vmatpush3.bf16.msra.mxu1 %v862_v56 }
 0x238   :  { %v651_v57 = vpop.f32.mrb[2].mxu1 }
 0x239   :  { %v652_v59 = vpop.f32.mrb[3].mxu1 }
 0x23a   :  { %v653_v60 = vadd.f32 %v652_v59, %v651_v57 }
 0x23c   :  { %v510_v61 = vadd.f32 %v653_v60, %v617_v58 }
 0x23e   :  { %v513_v62 = vmax.f32 %v510_v61, 0.0 }
 0x240   :  { %704 = vmatmul.mubr.f32.vlgmr.msra.gmra.mrb[4].mxu1 %v513_v62 }
 0x313   :  { %v603_v1 = vpop.f32.mrb[4].mxu1 }
 0x314   :  { %v604_v2 = vadd.f32 %v618_v63, %v603_v1  ;;  %v705_v3 = vpop.f32.mrb[5].mxu1 }
 0x316   :  { %607 = vst [vmem:[%s1163_s9] sm:$0xff] %v604_v2 }
 0x317   :  { %612 = vsyncpa [#allocation3], 1 }
 0x318   :  { %613 = vsyncpa [#allocation5], 1 }

</bundles_post_ra>
